<compile_context>
chip_gen: v7x
topology: tpu7x:2x2x1
jax: 0.10.0
libtpu: 0.0.40
codegen_flags: <defaults>
</compile_context>

<pallas_src>
import functools
import math

import jax
import jax.numpy as jnp
from jax.experimental import pallas as pl
from jax.experimental.pallas import tpu as pltpu


# ----------------------------------------------------------------------------
# The single fused kernel
# ----------------------------------------------------------------------------
def _vae_fused_kernel(
    # data (per-batch blocks)
    y_cn_ref, xt_ref, y_fn_ref, eps_ref,
    # weights (full, resident across grid steps)
    w_cn2_ref, w_cn3_ref, b_cn_ref,
    w_fn_ref, b_fn_ref,
    gcn_u_ref, gcn_v_ref, gcn_b_ref,
    proj_w_ref, proj_b_ref,
    enc_hw_ref, enc_hb_ref,
    obj_w_ref, obj_b_ref,
    dr_w_ref, dr_b_ref,
    l0_wz_ref, l0_wc_ref, l0_b_ref,
    l1_w_ref, l1_b_ref,
    # output + scratch
    out_ref, hbuf,
    *, num_cn, num_fn, latent, dec1,
):
    f32 = jnp.float32
    d3 = num_cn + num_fn
    n2 = 2 * d3

    y_cn = y_cn_ref[0]                       # (num_cn, 2)
    xt = xt_ref[0]                           # (num_cn, 1)
    y_fn = y_fn_ref[0]                       # (num_fn, 4)

    # ---- node embeddings; concatenated columns folded into matmul algebra ----
    # linear_cn([y_cn, col]) = y_cn @ W[:2] + col * W[2] + b
    base_cn = jnp.dot(y_cn, w_cn2_ref[...], preferred_element_type=f32) + b_cn_ref[...]
    h_fn = jnp.dot(y_fn, w_fn_ref[...], preferred_element_type=f32) + b_fn_ref[...]
    w_last = w_cn3_ref[...]                  # (1, 64)

    # stack both branches into one (2*d3, 64) row block (shared GCN matmuls)
    hbuf[0:num_cn, :] = base_cn + xt * w_last            # y_cns branch (col = xt)
    hbuf[num_cn:d3, :] = h_fn
    hbuf[d3:d3 + num_cn, :] = base_cn - w_last           # y_cn0 branch (col = -1)
    hbuf[d3 + num_cn:n2, :] = h_fn
    h_both = hbuf[...]                                   # (2*d3, 64)

    # ---- GCN stand-in, shared across both branches ----
    # adjacency = ones + eye  =>  A @ h = colsum(h) + h ;  deg = d3 + 1 (constant)
    h_s = h_both[0:d3]
    h_0 = h_both[d3:n2]
    sum_s = jnp.sum(h_s, axis=0, keepdims=True)          # (1, 64)
    sum_0 = jnp.sum(h_0, axis=0, keepdims=True)
    row = jax.lax.broadcasted_iota(jnp.int32, (n2, 1), 0)
    sums = jnp.where(row < d3, sum_s, sum_0)             # (2*d3, 64)
    inv_deg = 1.0 / float(d3 + 1)
    agg = (h_both + sums) * inv_deg

    msg = (jnp.dot(h_both, gcn_u_ref[...], preferred_element_type=f32)
           + jnp.dot(agg, gcn_v_ref[...], preferred_element_type=f32)
           + gcn_b_ref[...])
    hres = h_both + jnp.maximum(msg, 0.0)                # residual
    xg_both = jnp.maximum(
        jnp.dot(hres, proj_w_ref[...], preferred_element_type=f32) + proj_b_ref[...],
        0.0)                                             # (2*d3, H)

    x_gcn = xg_both[0:d3]                                # encoder input ("lat")
    x0_gcn = xg_both[d3:n2]                              # decoder condition

    # ---- encoder: heads fused into one matmul [means | log_var | obj_hidden] ----
    heads = jnp.dot(x_gcn, enc_hw_ref[...], preferred_element_type=f32) + enc_hb_ref[...]
    means = heads[:, 0:latent]
    log_var = heads[:, latent:2 * latent]
    obj_h = jnp.maximum(heads[:, 2 * latent:], 0.0)      # (d3, 128)
    obj = jax.nn.sigmoid(
        jnp.dot(obj_h, obj_w_ref[...], preferred_element_type=f32) + obj_b_ref[...])

    # ---- reparameterize ----
    z = means + eps_ref[0] * jnp.exp(0.5 * log_var)

    # ---- decoder: dim_red + MLP (L0 weight split over [z | c], no concat) ----
    c = jnp.dot(x0_gcn, dr_w_ref[...], preferred_element_type=f32) + dr_b_ref[...]
    h_dec = jnp.maximum(
        jnp.dot(z, l0_wz_ref[...], preferred_element_type=f32)
        + jnp.dot(c, l0_wc_ref[...], preferred_element_type=f32)
        + l0_b_ref[...], 0.0)
    recon = jax.nn.sigmoid(
        jnp.dot(h_dec, l1_w_ref[...], preferred_element_type=f32) + l1_b_ref[...])

    # ---- pack everything into one lane-dense output slab ----
    h_enc = x_gcn.shape[-1]
    o = 0
    out_ref[0, :, o:o + dec1] = recon;      o += dec1
    out_ref[0, :, o:o + latent] = means;    o += latent
    out_ref[0, :, o:o + latent] = log_var;  o += latent
    out_ref[0, :, o:o + latent] = z;        o += latent
    out_ref[0, :, o:o + 1] = obj;           o += 1
    out_ref[0, :, o:o + h_enc] = x_gcn;     o += h_enc
    pad = out_ref.shape[-1] - o
    if pad > 0:
        out_ref[0, :, o:] = jnp.zeros((d3, pad), f32)


# ----------------------------------------------------------------------------
# Parameter init (deterministic, PyTorch-Linear-style uniform), pre-fused layout
# ----------------------------------------------------------------------------
def init_linear(key, fan_in, fan_out):
    kw, kb = jax.random.split(key)
    bound = 1.0 / math.sqrt(fan_in)
    w = jax.random.uniform(kw, (fan_in, fan_out), jnp.float32, -bound, bound)
    b = jax.random.uniform(kb, (fan_out,), jnp.float32, -bound, bound)
    return w, b


def init_params(key, *, enc_hidden, latent, num_labels, dec_layers, gcn_dim):
    keys = jax.random.split(key, 12)
    p = {}
    # linear_cn (3 -> 64): split the last input row so the "-1"/xt column is algebraic
    w_cn, b_cn = init_linear(keys[0], 3, gcn_dim)
    p["w_cn2"], p["w_cn3"], p["b_cn"] = w_cn[:2], w_cn[2:3], b_cn.reshape(1, gcn_dim)
    # linear_fn (4 -> 64)
    w_fn, b_fn = init_linear(keys[1], 4, gcn_dim)
    p["w_fn"], p["b_fn"] = w_fn, b_fn.reshape(1, gcn_dim)
    # GCN stand-in params + projection to encoder hidden size
    gu, gb = init_linear(keys[2], gcn_dim, gcn_dim)
    gv, _ = init_linear(keys[3], gcn_dim, gcn_dim)
    p["gcn_u"], p["gcn_v"], p["gcn_b"] = gu, gv, gb.reshape(1, gcn_dim)
    pw, pb = init_linear(keys[4], gcn_dim, enc_hidden)
    p["gcn_proj_w"], p["gcn_proj_b"] = pw, pb.reshape(1, enc_hidden)
    # Encoder heads fused along N: [means(latent) | log_var(latent) | obj_hidden(128)]
    wm, bm = init_linear(keys[5], enc_hidden, latent)
    wl, bl = init_linear(keys[6], enc_hidden, latent)
    wo, bo = init_linear(keys[7], enc_hidden, 128)
    p["enc_heads_w"] = jnp.concatenate([wm, wl, wo], axis=1)
    p["enc_heads_b"] = jnp.concatenate([bm, bl, bo]).reshape(1, -1)
    ww, wb = init_linear(keys[8], 128, 1)
    p["enc_obj_out_w"], p["enc_obj_out_b"] = ww, wb.reshape(1, 1)
    # Decoder (conditional=True => MLP input = latent + num_labels); L0 split over rows
    dw, db = init_linear(keys[9], dec_layers[0], num_labels)
    p["dec_dim_red_w"], p["dec_dim_red_b"] = dw, db.reshape(1, num_labels)
    l0w, l0b = init_linear(keys[10], latent + num_labels, dec_layers[0])
    p["dec_L0_wz"], p["dec_L0_wc"] = l0w[:latent], l0w[latent:]
    p["dec_L0_b"] = l0b.reshape(1, dec_layers[0])
    l1w, l1b = init_linear(keys[11], dec_layers[0], dec_layers[1])
    p["dec_L1_w"], p["dec_L1_b"] = l1w, l1b.reshape(1, dec_layers[1])
    return p


_WEIGHT_ORDER = (
    "w_cn2", "w_cn3", "b_cn", "w_fn", "b_fn",
    "gcn_u", "gcn_v", "gcn_b", "gcn_proj_w", "gcn_proj_b",
    "enc_heads_w", "enc_heads_b", "enc_obj_out_w", "enc_obj_out_b",
    "dec_dim_red_w", "dec_dim_red_b",
    "dec_L0_wz", "dec_L0_wc", "dec_L0_b", "dec_L1_w", "dec_L1_b",
)


# ----------------------------------------------------------------------------
# VAE forward (mirrors VAE.forward with e provided) — ONE pallas_call
# ----------------------------------------------------------------------------
def vae_forward(params, x, y_cn, y_fn, eps_key, e):
    ind = e
    xt = x[:, ind]                                         # (bs, num_cn)
    bs, num_cn, _ = y_cn.shape
    num_fn = y_fn.shape[1]
    d3 = num_cn + num_fn

    enc_hw = params["enc_heads_w"]
    h_enc = enc_hw.shape[0]
    latent = (enc_hw.shape[1] - 128) // 2
    dec1 = params["dec_L1_w"].shape[1]
    gcn_dim = params["gcn_u"].shape[0]

    out_w = dec1 + 3 * latent + 1 + h_enc
    out_pad = ((out_w + 127) // 128) * 128                 # lane-dense output slab

    eps = jax.random.normal(eps_key, (bs, d3, latent), jnp.float32)
    xt3 = xt[:, :, None].astype(jnp.float32)

    weights = [params[n] for n in _WEIGHT_ORDER]

    kernel = functools.partial(
        _vae_fused_kernel, num_cn=num_cn, num_fn=num_fn, latent=latent, dec1=dec1)

    data_specs = [
        pl.BlockSpec((1, num_cn, 2), lambda b: (b, 0, 0)),
        pl.BlockSpec((1, num_cn, 1), lambda b: (b, 0, 0)),
        pl.BlockSpec((1, num_fn, 4), lambda b: (b, 0, 0)),
        pl.BlockSpec((1, d3, latent), lambda b: (b, 0, 0)),
    ]
    weight_specs = [pl.BlockSpec(w.shape, lambda b: (0, 0)) for w in weights]

    packed = pl.pallas_call(
        kernel,
        out_shape=jax.ShapeDtypeStruct((bs, d3, out_pad), jnp.float32),
        grid=(bs,),
        in_specs=data_specs + weight_specs,
        out_specs=pl.BlockSpec((1, d3, out_pad), lambda b: (b, 0, 0)),
        scratch_shapes=[pltpu.VMEM((2 * d3, gcn_dim), jnp.float32)],
        compiler_params=pltpu.CompilerParams(
            dimension_semantics=("parallel",)),               # 2 TCs on v7x; no-op on v5e/v6e
    )(y_cn.astype(jnp.float32), xt3, y_fn.astype(jnp.float32), eps, *weights)

    o = 0
    recon_x = packed[..., o:o + dec1]; o += dec1
    means = packed[..., o:o + latent]; o += latent
    log_var = packed[..., o:o + latent]; o += latent
    z = packed[..., o:o + latent]; o += latent
    obj = packed[..., o:o + 1]; o += 1
    lat = packed[..., o:o + h_enc]
    return recon_x, means, log_var, z, xt, obj, ind, lat


# ----------------------------------------------------------------------------
if __name__ == "__main__":
    # Config (conditional=True so decoder concat dims line up; dec_layers[0]==enc_hidden)
    bs, num_cn, num_fn, num_e = 2, 6, 2, 5
    gcn_dim = 64
    enc_hidden = 32            # encoder_layer_sizes[-1]
    latent = 16
    num_labels = 8
    dec_layers = [32, 20]      # decoder_layer_sizes

    root = jax.random.PRNGKey(0)
    kp, kx, kcn, kfn, keps = jax.random.split(root, 5)

    params = init_params(kp, enc_hidden=enc_hidden, latent=latent,
                         num_labels=num_labels, dec_layers=dec_layers,
                         gcn_dim=gcn_dim)

    x = jax.random.normal(kx, (bs, num_e, num_cn), jnp.float32)
    y_cn = jax.random.normal(kcn, (bs, num_cn, 2), jnp.float32)
    y_fn = jax.random.normal(kfn, (bs, num_fn, 4), jnp.float32)

    fwd = jax.jit(vae_forward, static_argnames=("e",))
    outs = fwd(params, x, y_cn, y_fn, keps, e=1)
    jax.block_until_ready(outs)

    recon_x, means, log_var, z, xt, obj, ind, lat = outs
    d3 = num_cn + num_fn
    assert recon_x.shape == (bs, d3, dec_layers[-1])
    assert means.shape == (bs, d3, latent)
    assert log_var.shape == (bs, d3, latent)
    assert z.shape == (bs, d3, latent)
    assert obj.shape == (bs, d3, 1)
    assert xt.shape == (bs, num_cn)
    assert lat.shape == (bs, d3, enc_hidden)
    assert bool(jnp.all(jnp.isfinite(recon_x)))
    print("KERNEL_OK")
</pallas_src>

<mosaic_0001>
module attributes {stable_mosaic.version = 11 : i64} {
  func.func @_vae_fused_kernel(%arg0: i32, %arg1: memref<1x6x2xf32, #tpu.memory_space<vmem>>, %arg2: memref<1x6x1xf32, #tpu.memory_space<vmem>>, %arg3: memref<1x2x4xf32, #tpu.memory_space<vmem>>, %arg4: memref<1x8x16xf32, #tpu.memory_space<vmem>>, %arg5: memref<2x64xf32, #tpu.memory_space<vmem>>, %arg6: memref<1x64xf32, #tpu.memory_space<vmem>>, %arg7: memref<1x64xf32, #tpu.memory_space<vmem>>, %arg8: memref<4x64xf32, #tpu.memory_space<vmem>>, %arg9: memref<1x64xf32, #tpu.memory_space<vmem>>, %arg10: memref<64x64xf32, #tpu.memory_space<vmem>>, %arg11: memref<64x64xf32, #tpu.memory_space<vmem>>, %arg12: memref<1x64xf32, #tpu.memory_space<vmem>>, %arg13: memref<64x32xf32, #tpu.memory_space<vmem>>, %arg14: memref<1x32xf32, #tpu.memory_space<vmem>>, %arg15: memref<32x160xf32, #tpu.memory_space<vmem>>, %arg16: memref<1x160xf32, #tpu.memory_space<vmem>>, %arg17: memref<128x1xf32, #tpu.memory_space<vmem>>, %arg18: memref<1x1xf32, #tpu.memory_space<vmem>>, %arg19: memref<32x8xf32, #tpu.memory_space<vmem>>, %arg20: memref<1x8xf32, #tpu.memory_space<vmem>>, %arg21: memref<16x32xf32, #tpu.memory_space<vmem>>, %arg22: memref<8x32xf32, #tpu.memory_space<vmem>>, %arg23: memref<1x32xf32, #tpu.memory_space<vmem>>, %arg24: memref<32x20xf32, #tpu.memory_space<vmem>>, %arg25: memref<1x20xf32, #tpu.memory_space<vmem>>, %arg26: memref<1x8x128xf32, #tpu.memory_space<vmem>>, %arg27: memref<16x64xf32, #tpu.memory_space<vmem>>) attributes {dimension_semantics = [#tpu.dimension_semantics<parallel>], iteration_bounds = array<i64: 2>, scalar_prefetch = 0 : i64, scratch_operands = 1 : i64, tpu.core_type = #tpu.core_type<tc>, window_params = [{transform_indices = @transform_0, window_bounds = array<i64: 1, 6, 2>}, {transform_indices = @transform_1, window_bounds = array<i64: 1, 6, 1>}, {transform_indices = @transform_2, window_bounds = array<i64: 1, 2, 4>}, {transform_indices = @transform_3, window_bounds = array<i64: 1, 8, 16>}, {pipeline_mode = #tpu.pipeline_mode<synchronous>, transform_indices = @transform_4, window_bounds = array<i64: 2, 64>}, {pipeline_mode = #tpu.pipeline_mode<synchronous>, transform_indices = @transform_5, window_bounds = array<i64: 1, 64>}, {pipeline_mode = #tpu.pipeline_mode<synchronous>, transform_indices = @transform_6, window_bounds = array<i64: 1, 64>}, {pipeline_mode = #tpu.pipeline_mode<synchronous>, transform_indices = @transform_7, window_bounds = array<i64: 4, 64>}, {pipeline_mode = #tpu.pipeline_mode<synchronous>, transform_indices = @transform_8, window_bounds = array<i64: 1, 64>}, {pipeline_mode = #tpu.pipeline_mode<synchronous>, transform_indices = @transform_9, window_bounds = array<i64: 64, 64>}, {pipeline_mode = #tpu.pipeline_mode<synchronous>, transform_indices = @transform_10, window_bounds = array<i64: 64, 64>}, {pipeline_mode = #tpu.pipeline_mode<synchronous>, transform_indices = @transform_11, window_bounds = array<i64: 1, 64>}, {pipeline_mode = #tpu.pipeline_mode<synchronous>, transform_indices = @transform_12, window_bounds = array<i64: 64, 32>}, {pipeline_mode = #tpu.pipeline_mode<synchronous>, transform_indices = @transform_13, window_bounds = array<i64: 1, 32>}, {pipeline_mode = #tpu.pipeline_mode<synchronous>, transform_indices = @transform_14, window_bounds = array<i64: 32, 160>}, {pipeline_mode = #tpu.pipeline_mode<synchronous>, transform_indices = @transform_15, window_bounds = array<i64: 1, 160>}, {pipeline_mode = #tpu.pipeline_mode<synchronous>, transform_indices = @transform_16, window_bounds = array<i64: 128, 1>}, {pipeline_mode = #tpu.pipeline_mode<synchronous>, transform_indices = @transform_17, window_bounds = array<i64: 1, 1>}, {pipeline_mode = #tpu.pipeline_mode<synchronous>, transform_indices = @transform_18, window_bounds = array<i64: 32, 8>}, {pipeline_mode = #tpu.pipeline_mode<synchronous>, transform_indices = @transform_19, window_bounds = array<i64: 1, 8>}, {pipeline_mode = #tpu.pipeline_mode<synchronous>, transform_indices = @transform_20, window_bounds = array<i64: 16, 32>}, {pipeline_mode = #tpu.pipeline_mode<synchronous>, transform_indices = @transform_21, window_bounds = array<i64: 8, 32>}, {pipeline_mode = #tpu.pipeline_mode<synchronous>, transform_indices = @transform_22, window_bounds = array<i64: 1, 32>}, {pipeline_mode = #tpu.pipeline_mode<synchronous>, transform_indices = @transform_23, window_bounds = array<i64: 32, 20>}, {pipeline_mode = #tpu.pipeline_mode<synchronous>, transform_indices = @transform_24, window_bounds = array<i64: 1, 20>}, {transform_indices = @transform_25, window_bounds = array<i64: 1, 8, 128>}]} {
    %c0 = arith.constant 0 : index
    %c0_0 = arith.constant 0 : index
    %c0_1 = arith.constant 0 : index
    %0 = vector.load %arg1[%c0, %c0_0, %c0_1] : memref<1x6x2xf32, #tpu.memory_space<vmem>>, vector<1x6x2xf32>
    %1 = vector.shape_cast %0 : vector<1x6x2xf32> to vector<6x2xf32>
    %c0_2 = arith.constant 0 : index
    %c0_3 = arith.constant 0 : index
    %c0_4 = arith.constant 0 : index
    %2 = vector.load %arg2[%c0_2, %c0_3, %c0_4] : memref<1x6x1xf32, #tpu.memory_space<vmem>>, vector<1x6x1xf32>
    %3 = vector.shape_cast %2 : vector<1x6x1xf32> to vector<6x1xf32>
    %c0_5 = arith.constant 0 : index
    %c0_6 = arith.constant 0 : index
    %c0_7 = arith.constant 0 : index
    %4 = vector.load %arg3[%c0_5, %c0_6, %c0_7] : memref<1x2x4xf32, #tpu.memory_space<vmem>>, vector<1x2x4xf32>
    %5 = vector.shape_cast %4 : vector<1x2x4xf32> to vector<2x4xf32>
    %c0_8 = arith.constant 0 : index
    %c0_9 = arith.constant 0 : index
    %6 = vector.load %arg5[%c0_8, %c0_9] : memref<2x64xf32, #tpu.memory_space<vmem>>, vector<2x64xf32>
    %cst = arith.constant dense<0.000000e+00> : vector<6x64xf32>
    %7 = tpu.matmul %1, %6, %cst {dimension_numbers = #tpu.dot_dimension_numbers<[1], [0], [0], [1], [0, 0, 1, 1], [], []>} : vector<6x2xf32>, vector<2x64xf32>, vector<6x64xf32> -> vector<6x64xf32>
    %c0_10 = arith.constant 0 : index
    %c0_11 = arith.constant 0 : index
    %8 = vector.load %arg7[%c0_10, %c0_11] : memref<1x64xf32, #tpu.memory_space<vmem>>, vector<1x64xf32>
    %9 = vector.broadcast %8 : vector<1x64xf32> to vector<6x64xf32>
    %10 = arith.addf %7, %9 : vector<6x64xf32>
    %c0_12 = arith.constant 0 : index
    %c0_13 = arith.constant 0 : index
    %11 = vector.load %arg8[%c0_12, %c0_13] : memref<4x64xf32, #tpu.memory_space<vmem>>, vector<4x64xf32>
    %cst_14 = arith.constant dense<0.000000e+00> : vector<2x64xf32>
    %12 = tpu.matmul %5, %11, %cst_14 {dimension_numbers = #tpu.dot_dimension_numbers<[1], [0], [0], [1], [0, 0, 1, 1], [], []>} : vector<2x4xf32>, vector<4x64xf32>, vector<2x64xf32> -> vector<2x64xf32>
    %c0_15 = arith.constant 0 : index
    %c0_16 = arith.constant 0 : index
    %13 = vector.load %arg9[%c0_15, %c0_16] : memref<1x64xf32, #tpu.memory_space<vmem>>, vector<1x64xf32>
    %14 = vector.broadcast %13 : vector<1x64xf32> to vector<2x64xf32>
    %15 = arith.addf %12, %14 : vector<2x64xf32>
    %c0_17 = arith.constant 0 : index
    %c0_18 = arith.constant 0 : index
    %16 = vector.load %arg6[%c0_17, %c0_18] : memref<1x64xf32, #tpu.memory_space<vmem>>, vector<1x64xf32>
    %17 = vector.broadcast %3 : vector<6x1xf32> to vector<6x64xf32>
    %18 = vector.broadcast %16 : vector<1x64xf32> to vector<6x64xf32>
    %19 = arith.mulf %17, %18 : vector<6x64xf32>
    %20 = arith.addf %10, %19 : vector<6x64xf32>
    %c0_19 = arith.constant 0 : index
    %c0_20 = arith.constant 0 : index
    %21 = vector.load %arg27[%c0_19, %c0_20] : memref<16x64xf32, #tpu.memory_space<vmem>>, vector<6x64xf32>
    tpu.vector_store %arg27[%c0_19, %c0_20], %20 {strides = array<i32>} : memref<16x64xf32, #tpu.memory_space<vmem>>, vector<6x64xf32>,
    %c6 = arith.constant 6 : index
    %c0_21 = arith.constant 0 : index
    %22 = vector.load %arg27[%c6, %c0_21] : memref<16x64xf32, #tpu.memory_space<vmem>>, vector<2x64xf32>
    tpu.vector_store %arg27[%c6, %c0_21], %15 {strides = array<i32>} : memref<16x64xf32, #tpu.memory_space<vmem>>, vector<2x64xf32>,
    %23 = vector.broadcast %16 : vector<1x64xf32> to vector<6x64xf32>
    %24 = arith.subf %10, %23 : vector<6x64xf32>
    %c8 = arith.constant 8 : index
    %c0_22 = arith.constant 0 : index
    %25 = vector.load %arg27[%c8, %c0_22] : memref<16x64xf32, #tpu.memory_space<vmem>>, vector<6x64xf32>
    tpu.vector_store %arg27[%c8, %c0_22], %24 {strides = array<i32>} : memref<16x64xf32, #tpu.memory_space<vmem>>, vector<6x64xf32>,
    %c14 = arith.constant 14 : index
    %c0_23 = arith.constant 0 : index
    %26 = vector.load %arg27[%c14, %c0_23] : memref<16x64xf32, #tpu.memory_space<vmem>>, vector<2x64xf32>
    tpu.vector_store %arg27[%c14, %c0_23], %15 {strides = array<i32>} : memref<16x64xf32, #tpu.memory_space<vmem>>, vector<2x64xf32>,
    %c0_24 = arith.constant 0 : index
    %c0_25 = arith.constant 0 : index
    %27 = vector.load %arg27[%c0_24, %c0_25] : memref<16x64xf32, #tpu.memory_space<vmem>>, vector<16x64xf32>
    %28 = vector.extract_strided_slice %27 {offsets = [0, 0], sizes = [8, 64], strides = [1, 1]} : vector<16x64xf32> to vector<8x64xf32>
    %29 = vector.extract_strided_slice %27 {offsets = [8, 0], sizes = [8, 64], strides = [1, 1]} : vector<16x64xf32> to vector<8x64xf32>
    %cst_26 = arith.constant dense<0.000000e+00> : vector<64xf32>
    %30 = vector.multi_reduction <add>, %28, %cst_26 [0] : vector<8x64xf32> to vector<64xf32>
    %31 = vector.shape_cast %30 : vector<64xf32> to vector<1x64xf32>
    %cst_27 = arith.constant dense<0.000000e+00> : vector<64xf32>
    %32 = vector.multi_reduction <add>, %29, %cst_27 [0] : vector<8x64xf32> to vector<64xf32>
    %33 = vector.shape_cast %32 : vector<64xf32> to vector<1x64xf32>
    %34 = tpu.iota {dimensions = array<i32: 0>} : vector<16x1xi32>
    %c8_i32 = arith.constant 8 : i32
    %35 = vector.broadcast %c8_i32 : i32 to vector<16x1xi32>
    %36 = arith.cmpi slt, %34, %35 : vector<16x1xi32>
    %37 = vector.shape_cast %36 : vector<16x1xi1> to vector<16x1xi1>
    %38 = vector.broadcast %37 : vector<16x1xi1> to vector<16x64xi1>
    %39 = vector.shape_cast %31 : vector<1x64xf32> to vector<1x64xf32>
    %40 = vector.broadcast %39 : vector<1x64xf32> to vector<16x64xf32>
    %41 = vector.shape_cast %33 : vector<1x64xf32> to vector<1x64xf32>
    %42 = vector.broadcast %41 : vector<1x64xf32> to vector<16x64xf32>
    %43 = arith.select %38, %40, %42 : vector<16x64xi1>, vector<16x64xf32>
    %44 = arith.addf %27, %43 : vector<16x64xf32>
    %cst_28 = arith.constant 0.111111112 : f32
    %45 = vector.broadcast %cst_28 : f32 to vector<16x64xf32>
    %46 = arith.mulf %44, %45 : vector<16x64xf32>
    %c0_29 = arith.constant 0 : index
    %c0_30 = arith.constant 0 : index
    %47 = vector.load %arg10[%c0_29, %c0_30] : memref<64x64xf32, #tpu.memory_space<vmem>>, vector<64x64xf32>
    %cst_31 = arith.constant dense<0.000000e+00> : vector<16x64xf32>
    %48 = tpu.matmul %27, %47, %cst_31 {dimension_numbers = #tpu.dot_dimension_numbers<[1], [0], [0], [1], [0, 0, 1, 1], [], []>} : vector<16x64xf32>, vector<64x64xf32>, vector<16x64xf32> -> vector<16x64xf32>
    %c0_32 = arith.constant 0 : index
    %c0_33 = arith.constant 0 : index
    %49 = vector.load %arg11[%c0_32, %c0_33] : memref<64x64xf32, #tpu.memory_space<vmem>>, vector<64x64xf32>
    %cst_34 = arith.constant dense<0.000000e+00> : vector<16x64xf32>
    %50 = tpu.matmul %46, %49, %cst_34 {dimension_numbers = #tpu.dot_dimension_numbers<[1], [0], [0], [1], [0, 0, 1, 1], [], []>} : vector<16x64xf32>, vector<64x64xf32>, vector<16x64xf32> -> vector<16x64xf32>
    %51 = arith.addf %48, %50 : vector<16x64xf32>
    %c0_35 = arith.constant 0 : index
    %c0_36 = arith.constant 0 : index
    %52 = vector.load %arg12[%c0_35, %c0_36] : memref<1x64xf32, #tpu.memory_space<vmem>>, vector<1x64xf32>
    %53 = vector.broadcast %52 : vector<1x64xf32> to vector<16x64xf32>
    %54 = arith.addf %51, %53 : vector<16x64xf32>
    %cst_37 = arith.constant 0.000000e+00 : f32
    %55 = vector.broadcast %cst_37 : f32 to vector<16x64xf32>
    %56 = arith.maximumf %54, %55 : vector<16x64xf32>
    %57 = arith.addf %27, %56 : vector<16x64xf32>
    %c0_38 = arith.constant 0 : index
    %c0_39 = arith.constant 0 : index
    %58 = vector.load %arg13[%c0_38, %c0_39] : memref<64x32xf32, #tpu.memory_space<vmem>>, vector<64x32xf32>
    %cst_40 = arith.constant dense<0.000000e+00> : vector<16x32xf32>
    %59 = tpu.matmul %57, %58, %cst_40 {dimension_numbers = #tpu.dot_dimension_numbers<[1], [0], [0], [1], [0, 0, 1, 1], [], []>} : vector<16x64xf32>, vector<64x32xf32>, vector<16x32xf32> -> vector<16x32xf32>
    %c0_41 = arith.constant 0 : index
    %c0_42 = arith.constant 0 : index
    %60 = vector.load %arg14[%c0_41, %c0_42] : memref<1x32xf32, #tpu.memory_space<vmem>>, vector<1x32xf32>
    %61 = vector.broadcast %60 : vector<1x32xf32> to vector<16x32xf32>
    %62 = arith.addf %59, %61 : vector<16x32xf32>
    %cst_43 = arith.constant 0.000000e+00 : f32
    %63 = vector.broadcast %cst_43 : f32 to vector<16x32xf32>
    %64 = arith.maximumf %62, %63 : vector<16x32xf32>
    %65 = vector.extract_strided_slice %64 {offsets = [0, 0], sizes = [8, 32], strides = [1, 1]} : vector<16x32xf32> to vector<8x32xf32>
    %66 = vector.extract_strided_slice %64 {offsets = [8, 0], sizes = [8, 32], strides = [1, 1]} : vector<16x32xf32> to vector<8x32xf32>
    %c0_44 = arith.constant 0 : index
    %c0_45 = arith.constant 0 : index
    %67 = vector.load %arg15[%c0_44, %c0_45] : memref<32x160xf32, #tpu.memory_space<vmem>>, vector<32x160xf32>
    %cst_46 = arith.constant dense<0.000000e+00> : vector<8x160xf32>
    %68 = tpu.matmul %65, %67, %cst_46 {dimension_numbers = #tpu.dot_dimension_numbers<[1], [0], [0], [1], [0, 0, 1, 1], [], []>} : vector<8x32xf32>, vector<32x160xf32>, vector<8x160xf32> -> vector<8x160xf32>
    %c0_47 = arith.constant 0 : index
    %c0_48 = arith.constant 0 : index
    %69 = vector.load %arg16[%c0_47, %c0_48] : memref<1x160xf32, #tpu.memory_space<vmem>>, vector<1x160xf32>
    %70 = vector.broadcast %69 : vector<1x160xf32> to vector<8x160xf32>
    %71 = arith.addf %68, %70 : vector<8x160xf32>
    %72 = vector.extract_strided_slice %71 {offsets = [0, 0], sizes = [8, 16], strides = [1, 1]} : vector<8x160xf32> to vector<8x16xf32>
    %73 = vector.extract_strided_slice %71 {offsets = [0, 16], sizes = [8, 16], strides = [1, 1]} : vector<8x160xf32> to vector<8x16xf32>
    %74 = vector.extract_strided_slice %71 {offsets = [0, 32], sizes = [8, 128], strides = [1, 1]} : vector<8x160xf32> to vector<8x128xf32>
    %cst_49 = arith.constant 0.000000e+00 : f32
    %75 = vector.broadcast %cst_49 : f32 to vector<8x128xf32>
    %76 = arith.maximumf %74, %75 : vector<8x128xf32>
    %c0_50 = arith.constant 0 : index
    %c0_51 = arith.constant 0 : index
    %77 = vector.load %arg17[%c0_50, %c0_51] : memref<128x1xf32, #tpu.memory_space<vmem>>, vector<128x1xf32>
    %cst_52 = arith.constant dense<0.000000e+00> : vector<8x1xf32>
    %78 = tpu.matmul %76, %77, %cst_52 {dimension_numbers = #tpu.dot_dimension_numbers<[1], [0], [0], [1], [0, 0, 1, 1], [], []>} : vector<8x128xf32>, vector<128x1xf32>, vector<8x1xf32> -> vector<8x1xf32>
    %c0_53 = arith.constant 0 : index
    %c0_54 = arith.constant 0 : index
    %79 = vector.load %arg18[%c0_53, %c0_54] : memref<1x1xf32, #tpu.memory_space<vmem>>, vector<1x1xf32>
    %80 = vector.broadcast %79 : vector<1x1xf32> to vector<8x1xf32>
    %81 = arith.addf %78, %80 : vector<8x1xf32>
    %82 = arith.negf %81 : vector<8x1xf32>
    %83 = math.exp %82 : vector<8x1xf32>
    %cst_55 = arith.constant 1.000000e+00 : f32
    %84 = vector.broadcast %cst_55 : f32 to vector<8x1xf32>
    %85 = arith.addf %84, %83 : vector<8x1xf32>
    %86 = arith.divf %84, %85 : vector<8x1xf32>
    %c0_56 = arith.constant 0 : index
    %c0_57 = arith.constant 0 : index
    %c0_58 = arith.constant 0 : index
    %87 = vector.load %arg4[%c0_56, %c0_57, %c0_58] : memref<1x8x16xf32, #tpu.memory_space<vmem>>, vector<1x8x16xf32>
    %88 = vector.shape_cast %87 : vector<1x8x16xf32> to vector<8x16xf32>
    %cst_59 = arith.constant 5.000000e-01 : f32
    %89 = vector.broadcast %cst_59 : f32 to vector<8x16xf32>
    %90 = arith.mulf %89, %73 : vector<8x16xf32>
    %91 = math.exp %90 : vector<8x16xf32>
    %92 = arith.mulf %88, %91 : vector<8x16xf32>
    %93 = arith.addf %72, %92 : vector<8x16xf32>
    %c0_60 = arith.constant 0 : index
    %c0_61 = arith.constant 0 : index
    %94 = vector.load %arg19[%c0_60, %c0_61] : memref<32x8xf32, #tpu.memory_space<vmem>>, vector<32x8xf32>
    %cst_62 = arith.constant dense<0.000000e+00> : vector<8x8xf32>
    %95 = tpu.matmul %66, %94, %cst_62 {dimension_numbers = #tpu.dot_dimension_numbers<[1], [0], [0], [1], [0, 0, 1, 1], [], []>} : vector<8x32xf32>, vector<32x8xf32>, vector<8x8xf32> -> vector<8x8xf32>
    %c0_63 = arith.constant 0 : index
    %c0_64 = arith.constant 0 : index
    %96 = vector.load %arg20[%c0_63, %c0_64] : memref<1x8xf32, #tpu.memory_space<vmem>>, vector<1x8xf32>
    %97 = vector.broadcast %96 : vector<1x8xf32> to vector<8x8xf32>
    %98 = arith.addf %95, %97 : vector<8x8xf32>
    %c0_65 = arith.constant 0 : index
    %c0_66 = arith.constant 0 : index
    %99 = vector.load %arg21[%c0_65, %c0_66] : memref<16x32xf32, #tpu.memory_space<vmem>>, vector<16x32xf32>
    %cst_67 = arith.constant dense<0.000000e+00> : vector<8x32xf32>
    %100 = tpu.matmul %93, %99, %cst_67 {dimension_numbers = #tpu.dot_dimension_numbers<[1], [0], [0], [1], [0, 0, 1, 1], [], []>} : vector<8x16xf32>, vector<16x32xf32>, vector<8x32xf32> -> vector<8x32xf32>
    %c0_68 = arith.constant 0 : index
    %c0_69 = arith.constant 0 : index
    %101 = vector.load %arg22[%c0_68, %c0_69] : memref<8x32xf32, #tpu.memory_space<vmem>>, vector<8x32xf32>
    %cst_70 = arith.constant dense<0.000000e+00> : vector<8x32xf32>
    %102 = tpu.matmul %98, %101, %cst_70 {dimension_numbers = #tpu.dot_dimension_numbers<[1], [0], [0], [1], [0, 0, 1, 1], [], []>} : vector<8x8xf32>, vector<8x32xf32>, vector<8x32xf32> -> vector<8x32xf32>
    %103 = arith.addf %100, %102 : vector<8x32xf32>
    %c0_71 = arith.constant 0 : index
    %c0_72 = arith.constant 0 : index
    %104 = vector.load %arg23[%c0_71, %c0_72] : memref<1x32xf32, #tpu.memory_space<vmem>>, vector<1x32xf32>
    %105 = vector.broadcast %104 : vector<1x32xf32> to vector<8x32xf32>
    %106 = arith.addf %103, %105 : vector<8x32xf32>
    %cst_73 = arith.constant 0.000000e+00 : f32
    %107 = vector.broadcast %cst_73 : f32 to vector<8x32xf32>
    %108 = arith.maximumf %106, %107 : vector<8x32xf32>
    %c0_74 = arith.constant 0 : index
    %c0_75 = arith.constant 0 : index
    %109 = vector.load %arg24[%c0_74, %c0_75] : memref<32x20xf32, #tpu.memory_space<vmem>>, vector<32x20xf32>
    %cst_76 = arith.constant dense<0.000000e+00> : vector<8x20xf32>
    %110 = tpu.matmul %108, %109, %cst_76 {dimension_numbers = #tpu.dot_dimension_numbers<[1], [0], [0], [1], [0, 0, 1, 1], [], []>} : vector<8x32xf32>, vector<32x20xf32>, vector<8x20xf32> -> vector<8x20xf32>
    %c0_77 = arith.constant 0 : index
    %c0_78 = arith.constant 0 : index
    %111 = vector.load %arg25[%c0_77, %c0_78] : memref<1x20xf32, #tpu.memory_space<vmem>>, vector<1x20xf32>
    %112 = vector.broadcast %111 : vector<1x20xf32> to vector<8x20xf32>
    %113 = arith.addf %110, %112 : vector<8x20xf32>
    %114 = arith.negf %113 : vector<8x20xf32>
    %115 = math.exp %114 : vector<8x20xf32>
    %cst_79 = arith.constant 1.000000e+00 : f32
    %116 = vector.broadcast %cst_79 : f32 to vector<8x20xf32>
    %117 = arith.addf %116, %115 : vector<8x20xf32>
    %118 = arith.divf %116, %117 : vector<8x20xf32>
    %c0_80 = arith.constant 0 : index
    %c0_81 = arith.constant 0 : index
    %c0_82 = arith.constant 0 : index
    %119 = vector.load %arg26[%c0_80, %c0_81, %c0_82] : memref<1x8x128xf32, #tpu.memory_space<vmem>>, vector<1x8x20xf32>
    %120 = vector.shape_cast %119 : vector<1x8x20xf32> to vector<8x20xf32>
    %121 = vector.shape_cast %118 : vector<8x20xf32> to vector<1x8x20xf32>
    tpu.vector_store %arg26[%c0_80, %c0_81, %c0_82], %121 {strides = array<i32>} : memref<1x8x128xf32, #tpu.memory_space<vmem>>, vector<1x8x20xf32>,
    %c0_83 = arith.constant 0 : index
    %c0_84 = arith.constant 0 : index
    %c20 = arith.constant 20 : index
    %122 = vector.load %arg26[%c0_83, %c0_84, %c20] : memref<1x8x128xf32, #tpu.memory_space<vmem>>, vector<1x8x16xf32>
    %123 = vector.shape_cast %122 : vector<1x8x16xf32> to vector<8x16xf32>
    %124 = vector.shape_cast %72 : vector<8x16xf32> to vector<1x8x16xf32>
    tpu.vector_store %arg26[%c0_83, %c0_84, %c20], %124 {strides = array<i32>} : memref<1x8x128xf32, #tpu.memory_space<vmem>>, vector<1x8x16xf32>,
    %c0_85 = arith.constant 0 : index
    %c0_86 = arith.constant 0 : index
    %c36 = arith.constant 36 : index
    %125 = vector.load %arg26[%c0_85, %c0_86, %c36] : memref<1x8x128xf32, #tpu.memory_space<vmem>>, vector<1x8x16xf32>
    %126 = vector.shape_cast %125 : vector<1x8x16xf32> to vector<8x16xf32>
    %127 = vector.shape_cast %73 : vector<8x16xf32> to vector<1x8x16xf32>
    tpu.vector_store %arg26[%c0_85, %c0_86, %c36], %127 {strides = array<i32>} : memref<1x8x128xf32, #tpu.memory_space<vmem>>, vector<1x8x16xf32>,
    %c0_87 = arith.constant 0 : index
    %c0_88 = arith.constant 0 : index
    %c52 = arith.constant 52 : index
    %128 = vector.load %arg26[%c0_87, %c0_88, %c52] : memref<1x8x128xf32, #tpu.memory_space<vmem>>, vector<1x8x16xf32>
    %129 = vector.shape_cast %128 : vector<1x8x16xf32> to vector<8x16xf32>
    %130 = vector.shape_cast %93 : vector<8x16xf32> to vector<1x8x16xf32>
    tpu.vector_store %arg26[%c0_87, %c0_88, %c52], %130 {strides = array<i32>} : memref<1x8x128xf32, #tpu.memory_space<vmem>>, vector<1x8x16xf32>,
    %c0_89 = arith.constant 0 : index
    %c0_90 = arith.constant 0 : index
    %c68 = arith.constant 68 : index
    %131 = vector.load %arg26[%c0_89, %c0_90, %c68] : memref<1x8x128xf32, #tpu.memory_space<vmem>>, vector<1x8x1xf32>
    %132 = vector.shape_cast %131 : vector<1x8x1xf32> to vector<8x1xf32>
    %133 = vector.shape_cast %86 : vector<8x1xf32> to vector<1x8x1xf32>
    tpu.vector_store %arg26[%c0_89, %c0_90, %c68], %133 {strides = array<i32>} : memref<1x8x128xf32, #tpu.memory_space<vmem>>, vector<1x8x1xf32>,
    %c0_91 = arith.constant 0 : index
    %c0_92 = arith.constant 0 : index
    %c69 = arith.constant 69 : index
    %134 = vector.load %arg26[%c0_91, %c0_92, %c69] : memref<1x8x128xf32, #tpu.memory_space<vmem>>, vector<1x8x32xf32>
    %135 = vector.shape_cast %134 : vector<1x8x32xf32> to vector<8x32xf32>
    %136 = vector.shape_cast %65 : vector<8x32xf32> to vector<1x8x32xf32>
    tpu.vector_store %arg26[%c0_91, %c0_92, %c69], %136 {strides = array<i32>} : memref<1x8x128xf32, #tpu.memory_space<vmem>>, vector<1x8x32xf32>,
    %cst_93 = arith.constant 0.000000e+00 : f32
    %137 = vector.broadcast %cst_93 : f32 to vector<8x27xf32>
    %c0_94 = arith.constant 0 : index
    %c0_95 = arith.constant 0 : index
    %c101 = arith.constant 101 : index
    %138 = vector.load %arg26[%c0_94, %c0_95, %c101] : memref<1x8x128xf32, #tpu.memory_space<vmem>>, vector<1x8x27xf32>
    %139 = vector.shape_cast %138 : vector<1x8x27xf32> to vector<8x27xf32>
    %140 = vector.shape_cast %137 : vector<8x27xf32> to vector<1x8x27xf32>
    tpu.vector_store %arg26[%c0_94, %c0_95, %c101], %140 {strides = array<i32>} : memref<1x8x128xf32, #tpu.memory_space<vmem>>, vector<1x8x27xf32>,
    return
  }
  func.func @transform_0(%arg0: i32) -> (i32, i32, i32) {
    %c0_i32 = arith.constant 0 : i32
    %c0_i32_0 = arith.constant 0 : i32
    %c0_i32_1 = arith.constant 0 : i32
    return %arg0, %c0_i32, %c0_i32_0 : i32, i32, i32
  }
  func.func @transform_1(%arg0: i32) -> (i32, i32, i32) {
    %c0_i32 = arith.constant 0 : i32
    %c0_i32_0 = arith.constant 0 : i32
    %c0_i32_1 = arith.constant 0 : i32
    return %arg0, %c0_i32, %c0_i32_0 : i32, i32, i32
  }
  func.func @transform_2(%arg0: i32) -> (i32, i32, i32) {
    %c0_i32 = arith.constant 0 : i32
    %c0_i32_0 = arith.constant 0 : i32
    %c0_i32_1 = arith.constant 0 : i32
    return %arg0, %c0_i32, %c0_i32_0 : i32, i32, i32
  }
  func.func @transform_3(%arg0: i32) -> (i32, i32, i32) {
    %c0_i32 = arith.constant 0 : i32
    %c0_i32_0 = arith.constant 0 : i32
    %c0_i32_1 = arith.constant 0 : i32
    return %arg0, %c0_i32, %c0_i32_0 : i32, i32, i32
  }
  func.func @transform_4(%arg0: i32) -> (i32, i32) {
    %c0_i32 = arith.constant 0 : i32
    %c0_i32_0 = arith.constant 0 : i32
    %c0_i32_1 = arith.constant 0 : i32
    return %c0_i32, %c0_i32_0 : i32, i32
  }
  func.func @transform_5(%arg0: i32) -> (i32, i32) {
    %c0_i32 = arith.constant 0 : i32
    %c0_i32_0 = arith.constant 0 : i32
    %c0_i32_1 = arith.constant 0 : i32
    return %c0_i32, %c0_i32_0 : i32, i32
  }
  func.func @transform_6(%arg0: i32) -> (i32, i32) {
    %c0_i32 = arith.constant 0 : i32
    %c0_i32_0 = arith.constant 0 : i32
    %c0_i32_1 = arith.constant 0 : i32
    return %c0_i32, %c0_i32_0 : i32, i32
  }
  func.func @transform_7(%arg0: i32) -> (i32, i32) {
    %c0_i32 = arith.constant 0 : i32
    %c0_i32_0 = arith.constant 0 : i32
    %c0_i32_1 = arith.constant 0 : i32
    return %c0_i32, %c0_i32_0 : i32, i32
  }
  func.func @transform_8(%arg0: i32) -> (i32, i32) {
    %c0_i32 = arith.constant 0 : i32
    %c0_i32_0 = arith.constant 0 : i32
    %c0_i32_1 = arith.constant 0 : i32
    return %c0_i32, %c0_i32_0 : i32, i32
  }
  func.func @transform_9(%arg0: i32) -> (i32, i32) {
    %c0_i32 = arith.constant 0 : i32
    %c0_i32_0 = arith.constant 0 : i32
    %c0_i32_1 = arith.constant 0 : i32
    return %c0_i32, %c0_i32_0 : i32, i32
  }
  func.func @transform_10(%arg0: i32) -> (i32, i32) {
    %c0_i32 = arith.constant 0 : i32
    %c0_i32_0 = arith.constant 0 : i32
    %c0_i32_1 = arith.constant 0 : i32
    return %c0_i32, %c0_i32_0 : i32, i32
  }
  func.func @transform_11(%arg0: i32) -> (i32, i32) {
    %c0_i32 = arith.constant 0 : i32
    %c0_i32_0 = arith.constant 0 : i32
    %c0_i32_1 = arith.constant 0 : i32
    return %c0_i32, %c0_i32_0 : i32, i32
  }
  func.func @transform_12(%arg0: i32) -> (i32, i32) {
    %c0_i32 = arith.constant 0 : i32
    %c0_i32_0 = arith.constant 0 : i32
    %c0_i32_1 = arith.constant 0 : i32
    return %c0_i32, %c0_i32_0 : i32, i32
  }
  func.func @transform_13(%arg0: i32) -> (i32, i32) {
    %c0_i32 = arith.constant 0 : i32
    %c0_i32_0 = arith.constant 0 : i32
    %c0_i32_1 = arith.constant 0 : i32
    return %c0_i32, %c0_i32_0 : i32, i32
  }
  func.func @transform_14(%arg0: i32) -> (i32, i32) {
    %c0_i32 = arith.constant 0 : i32
    %c0_i32_0 = arith.constant 0 : i32
    %c0_i32_1 = arith.constant 0 : i32
    return %c0_i32, %c0_i32_0 : i32, i32
  }
  func.func @transform_15(%arg0: i32) -> (i32, i32) {
    %c0_i32 = arith.constant 0 : i32
    %c0_i32_0 = arith.constant 0 : i32
    %c0_i32_1 = arith.constant 0 : i32
    return %c0_i32, %c0_i32_0 : i32, i32
  }
  func.func @transform_16(%arg0: i32) -> (i32, i32) {
    %c0_i32 = arith.constant 0 : i32
    %c0_i32_0 = arith.constant 0 : i32
    %c0_i32_1 = arith.constant 0 : i32
    return %c0_i32, %c0_i32_0 : i32, i32
  }
  func.func @transform_17(%arg0: i32) -> (i32, i32) {
    %c0_i32 = arith.constant 0 : i32
    %c0_i32_0 = arith.constant 0 : i32
    %c0_i32_1 = arith.constant 0 : i32
    return %c0_i32, %c0_i32_0 : i32, i32
  }
  func.func @transform_18(%arg0: i32) -> (i32, i32) {
    %c0_i32 = arith.constant 0 : i32
    %c0_i32_0 = arith.constant 0 : i32
    %c0_i32_1 = arith.constant 0 : i32
    return %c0_i32, %c0_i32_0 : i32, i32
  }
  func.func @transform_19(%arg0: i32) -> (i32, i32) {
    %c0_i32 = arith.constant 0 : i32
    %c0_i32_0 = arith.constant 0 : i32
    %c0_i32_1 = arith.constant 0 : i32
    return %c0_i32, %c0_i32_0 : i32, i32
  }
  func.func @transform_20(%arg0: i32) -> (i32, i32) {
    %c0_i32 = arith.constant 0 : i32
    %c0_i32_0 = arith.constant 0 : i32
    %c0_i32_1 = arith.constant 0 : i32
    return %c0_i32, %c0_i32_0 : i32, i32
  }
  func.func @transform_21(%arg0: i32) -> (i32, i32) {
    %c0_i32 = arith.constant 0 : i32
    %c0_i32_0 = arith.constant 0 : i32
    %c0_i32_1 = arith.constant 0 : i32
    return %c0_i32, %c0_i32_0 : i32, i32
  }
  func.func @transform_22(%arg0: i32) -> (i32, i32) {
    %c0_i32 = arith.constant 0 : i32
    %c0_i32_0 = arith.constant 0 : i32
    %c0_i32_1 = arith.constant 0 : i32
    return %c0_i32, %c0_i32_0 : i32, i32
  }
  func.func @transform_23(%arg0: i32) -> (i32, i32) {
    %c0_i32 = arith.constant 0 : i32
    %c0_i32_0 = arith.constant 0 : i32
    %c0_i32_1 = arith.constant 0 : i32
    return %c0_i32, %c0_i32_0 : i32, i32
  }
  func.func @transform_24(%arg0: i32) -> (i32, i32) {
    %c0_i32 = arith.constant 0 : i32
    %c0_i32_0 = arith.constant 0 : i32
    %c0_i32_1 = arith.constant 0 : i32
    return %c0_i32, %c0_i32_0 : i32, i32
  }
  func.func @transform_25(%arg0: i32) -> (i32, i32, i32) {
    %c0_i32 = arith.constant 0 : i32
    %c0_i32_0 = arith.constant 0 : i32
    %c0_i32_1 = arith.constant 0 : i32
    return %arg0, %c0_i32, %c0_i32_0 : i32, i32, i32
  }
}

</mosaic_0001>

<bundles_post_ra>
// kernel: vae_forward.1
= control target key start
LH: loop header
LB: loop body
LE: loop exit
PB: predicated region body
PF: predicated region fallthrough
CT: control target
= control target key end

     0   :  { %s2822_s0 = inlined_call_operand.vmem [shape: f32[2,6,2], index: 0, kind: input, shape index: {}]   ;;  %s2823_s1 = inlined_call_operand.vmem [shape: f32[2,6,1], index: 1, kind: input, shape index: {}]   ;;  %s2824_s2 = inlined_call_operand.vmem [shape: f32[2,2,4], index: 2, kind: input, shape index: {}]   ;;  %s2825_s3 = inlined_call_operand.vmem [shape: f32[2,8,16], index: 3, kind: input, shape index: {}]   ;;  %s2826_s4 = inlined_call_operand.vmem [shape: f32[2,64], index: 4, kind: input, shape index: {}]   ;;  %s2827_s5 = inlined_call_operand.vmem [shape: f32[1,64], index: 5, kind: input, shape index: {}]   ;;  %s2828_s6 = inlined_call_operand.vmem [shape: f32[1,64], index: 6, kind: input, shape index: {}]   ;;  %s2829_s7 = inlined_call_operand.vmem [shape: f32[4,64], index: 7, kind: input, shape index: {}]   ;;  %s2830_s8 = inlined_call_operand.vmem [shape: f32[1,64], index: 8, kind: input, shape index: {}]   ;;  %s2831_s9 = inlined_call_operand.vmem [shape: f32[64,64], index: 9, kind: input, shape index: {}]   ;;  %s2832_s10 = inlined_call_operand.vmem [shape: f32[64,64], index: 10, kind: input, shape index: {}]   ;;  %s2833_s11 = inlined_call_operand.vmem [shape: f32[1,64], index: 11, kind: input, shape index: {}]   ;;  %s2834_s12 = inlined_call_operand.vmem [shape: f32[64,32], index: 12, kind: input, shape index: {}]   ;;  %s2835_s13 = inlined_call_operand.vmem [shape: f32[1,32], index: 13, kind: input, shape index: {}]   ;;  %s2836_s14 = inlined_call_operand.vmem [shape: f32[32,160], index: 14, kind: input, shape index: {}]   ;;  %s2837_s15 = inlined_call_operand.vmem [shape: f32[1,160], index: 15, kind: input, shape index: {}]   ;;  %s2838_s16 = inlined_call_operand.vmem [shape: f32[128,1], index: 16, kind: input, shape index: {}]   ;;  %s2839_s17 = inlined_call_operand.<no memory space> [shape: f32[1,1], index: 17, kind: input, shape index: {}]   ;;  %s2840_s18 = inlined_call_operand.vmem [shape: f32[32,8], index: 18, kind: input, shape index: {}]   ;;  %s2841_s19 = inlined_call_operand.vmem [shape: f32[1,8], index: 19, kind: input, shape index: {}]   ;;  %s2842_s20 = inlined_call_operand.vmem [shape: f32[16,32], index: 20, kind: input, shape index: {}]   ;;  %s2843_s21 = inlined_call_operand.vmem [shape: f32[8,32], index: 21, kind: input, shape index: {}]   ;;  %s2844_s22 = inlined_call_operand.vmem [shape: f32[1,32], index: 22, kind: input, shape index: {}]   ;;  %s2845_s23 = inlined_call_operand.vmem [shape: f32[32,20], index: 23, kind: input, shape index: {}]   ;;  %s2846_s24 = inlined_call_operand.vmem [shape: f32[1,20], index: 24, kind: input, shape index: {}]   ;;  %s2847_s25 = inlined_call_operand.vmem [shape: f32[2,8,128], index: 25, kind: output, shape index: {}]  }
   0x1   :  { %2850 = sst [smem:[#allocation5_spill]] %s2822_s0  ;;  %v30_v0 = vstv %s2839_s17 }
   0x2   :  { %2851 = sst [smem:[#allocation6_spill]] %s2823_s1  ;;  %31 = vst [vmem:[#allocation3] sm:$0x1] %v30_v0 }
   0x3   :  { %2852 = sst [smem:[#allocation7_spill]] %s2824_s2 }
   0x4   :  { %2853 = sst [smem:[#allocation8_spill]] %s2825_s3 }
   0x5   :  { %2854 = sst [smem:[#allocation9_spill]] %s2826_s4 }
   0x6   :  { %2855 = sst [smem:[#allocation10_spill]] %s2827_s5 }
   0x7   :  { %2856 = sst [smem:[#allocation11_spill]] %s2828_s6  ;;  %s2518_s6 = smov 0  }
   0x8   :  { %2857 = sst [smem:[#allocation12_spill]] %s2829_s7 }
   0x9   :  { %2858 = sst [smem:[#allocation13_spill]] %s2830_s8 }
   0xa   :  { %2859 = sst [smem:[#allocation14_spill]] %s2831_s9 }
   0xb LB: > { %2860 = sst [smem:[#allocation4_spill]] %s2373_s6  ;;  %s1996_s30 = sadd.s32 4294967295, %s2373_s6   ;;  %s2373_s6 = sphi %s2518_s6, %s37_s6  }
   0xc   : > { %p2000_p0 = scmp.ge.s32.totalorder %s2373_s6, 1  ;;  %p715_p1 = scmp.lt.s32.totalorder %s2373_s6, 3 }
   0xe   : > { %p716_p2 = pnand %p2000_p0, %p715_p1 }
   0xf   : > { %s2861_s26 = sld [smem:[#allocation9_spill]] (!%p716_p2)  ;;  %vm828_vm0 = vcmask (!%p716_p2), 1041408   ;;  %p793_p3 = scmp.lt.s32.totalorder (!%p716_p2), %s1996_s30, 1  ;;  %v2375_v2 = vmov (!%p716_p2), 0.0   ;;  %vm2376_vm1 = vmmov (!%p716_p2), 0   ;;  %vm914_vm2 = vcmask (!%p716_p2), 1043456  }
  0x10   : > { %719 = sbr.rel (%p716_p2) target bundleno = 1535 (0x5ff), region = 120  ;;  %2100 = vmatprep.subr.mxu0 (!%p716_p2), %v2375_v2  ;;  %2102 = vmatprep.mubr.msk.f32.mxu0 (!%p716_p2), %vm2376_vm1, %v2375_v2  ;;  %s2862_s8 = sld [smem:[#allocation12_spill]] (!%p716_p2)  ;;  %vm824_vm3 = vcmask (!%p716_p2), 15360   ;;  %v2377_v4 = vmov (!%p716_p2), 0   ;;  %vm910_vm4 = vcmask (!%p716_p2), 31744   ;;  %v1049_v8 = vld [vmem:[%s2832_s10] sm:$0xff] (!%p716_p2) }
  0x11   : > { %2105 = vmatprep.subr.mxu1 (!%p716_p2), %v2375_v2  ;;  %2107 = vmatprep.mubr.msk.f32.mxu1 (!%p716_p2), %vm2376_vm1, %v2375_v2  ;;  %s2863_s5 = sld [smem:[#allocation5_spill]] (!%p716_p2)  ;;  %s2864_s7 = sld [smem:[#allocation7_spill]] (!%p716_p2)  ;;  %v1050_v9 = vld [vmem:[%s2832_s10 + $0x8] sm:$0xff] (!%p716_p2)  ;;  %v1051_v10 = vld [vmem:[%s2832_s10 + $0x10] sm:$0xff] (!%p716_p2)  ;;  %v1052_v12 = vld [vmem:[%s2832_s10 + $0x18] sm:$0xff] (!%p716_p2)  ;;  %vm1004_vm5 = vcmask (!%p716_p2), 517120  }
  0x12   : > { %2351 = vset.pattern.permute.xlu0 (!%p716_p2), %v2377_v4  ;;  %s2865_s1 = sld [smem:[#allocation6_spill]] (!%p716_p2)  ;;  %v2236_v11 = vpack.c.bf16 (!%p716_p2), %v1050_v9, %v1049_v8  ;;  %v2240_v13 = vpack.c.bf16 (!%p716_p2), %v1052_v12, %v1051_v10  ;;  %v1053_v14 = vld [vmem:[%s2832_s10 + $0x20] sm:$0xff] (!%p716_p2)  ;;  %v1054_v15 = vld [vmem:[%s2832_s10 + $0x28] sm:$0xff] (!%p716_p2)  ;;  %v1055_v17 = vld [vmem:[%s2832_s10 + $0x30] sm:$0xff] (!%p716_p2)  ;;  %s2869_s2 = sld [smem:[#allocation13_spill]] (!%p716_p2)  ;;  %vm1002_vm6 = vcmask (!%p716_p2), 521216  }
  0x13   : > { %v2244_v16 = vpack.c.bf16 (!%p716_p2), %v1054_v15, %v1053_v14  ;;  %v1056_v18 = vld [vmem:[%s2832_s10 + $0x38] sm:$0xff] (!%p716_p2)  ;;  %s2866_s9 = sld [smem:[#allocation14_spill]] (!%p716_p2)  ;;  %v1232_v23 = vld [vmem:[%s2834_s12] sm:$0xff] (!%p716_p2)  ;;  %v1233_v24 = vld [vmem:[%s2834_s12 + $0x8] sm:$0xff] (!%p716_p2)  ;;  %vm1011_vm7 = vcmask (!%p716_p2), 523264   ;;  %vm1350_vm8 = vcmask (!%p716_p2), 261120  }
  0x14   : > { %v2248_v19 = vpack.c.bf16 (!%p716_p2), %v1056_v18, %v1055_v17  ;;  %v1234_v25 = vld [vmem:[%s2834_s12 + $0x10] sm:$0xff] (!%p716_p2)  ;;  %v2268_v26 = vpack.c.bf16 (!%p716_p2), %v1233_v24, %v1232_v23  ;;  %v1235_v27 = vld [vmem:[%s2834_s12 + $0x18] sm:$0xff] (!%p716_p2)  ;;  %v1236_v8 = vld [vmem:[%s2834_s12 + $0x20] sm:$0xff] (!%p716_p2)  ;;  %v2378_v17 = vmov (!%p716_p2), 0.0|0.0   ;;  %vm1632_vm9 = vcmask (!%p716_p2), 64512   ;;  %s2381_s28 = smov (!%p716_p2), 112  }
  0x15   : > { %v816_v1 = vld [vmem:[%s2861_s26] sm:$0x3] (!%p716_p2)  ;;  %v2272_v28 = vpack.c.bf16 (!%p716_p2), %v1235_v27, %v1234_v25  ;;  %v1237_v9 = vld [vmem:[%s2834_s12 + $0x28] sm:$0xff] (!%p716_p2)  ;;  %v1239_v12 = vld [vmem:[%s2834_s12 + $0x38] sm:$0xff] (!%p716_p2)  ;;  %vm1456_vm10 = vcmask (!%p716_p2), 785408   ;;  %vm1706_vm11 = vcmask (!%p716_p2), 130048  }
  0x16   : > { %v902_v3 = vld [vmem:[%s2862_s8] sm:$0xf] (!%p716_p2)  ;;  %2101 = vmatpush3.msk.msra.mxu0 (!%p716_p2), %vm828_vm0, %v816_v1  ;;  %v2276_v10 = vpack.c.bf16 (!%p716_p2), %v1237_v9, %v1236_v8  ;;  %v1331_v14 = vld [vmem:[%s2836_s14 + $0x8] sm:$0xff] (!%p716_p2)  ;;  %v1333_v15 = vld [vmem:[%s2836_s14 + $0x18] sm:$0xff] (!%p716_p2)  ;;  %v1340_v8 = vlaneseq (!%p716_p2)  ;;  %vm1879_vm12 = vcmask (!%p716_p2), 162816   ;;  %vm1885_vm13 = vcmask (!%p716_p2), 294048  }
  0x17   : > { %s2873_s30 = smov (!%p793_p3, %s1996_s30), 1  ;;  %2106 = vmatpush3.msk.msra.mxu1 %vm914_vm2, %v902_v3  ;;  %2237 = vmatprep.subr.bf16.mxu0 %v2236_v11  ;;  %v2284_v18 = vpack.c.bf16 %v1333_v15, %v1331_v14  ;;  %v1330_v27 = vld [vmem:[%s2836_s14] sm:$0xff]  ;;  %vm1887_vm14 = vcmask 425248   ;;  %vm1892_vm15 = vcmask 556448   ;;  %vm1898_vm0 = vcmask 564768  }
  0x18   : > { %s2538_s27 = sshll.u32 %s2873_s30, 3  ;;  %s2003_s4 = sshll.u32 %s2873_s30, 1  ;;  %2269 = vmatprep.subr.bf16.mxu1 %v2268_v26  ;;  %v2009_v33 = vld [vmem:[%s2869_s2] ss:$0 sm:$0xff]  ;;  %v1341_v9 = vshrl.u32 %v1340_v8, 7  ;;  %vm1905_vm2 = vcmask 1048360  }
  0x19   : > { %s796_s0 = scalar_lea.vmem %s2863_s5, %s2538_s27  ;;  %s804_s3 = scalar_lea.vmem %s2864_s7, %s2003_s4  ;;  %v1041_v20 = vld [vmem:[%s2866_s9] sm:$0xff]  ;;  %v1042_v21 = vld [vmem:[%s2866_s9 + $0x8] sm:$0xff]  ;;  %v1043_v60 = vld [vmem:[%s2866_s9 + $0x10] sm:$0xff] }
  0x1a   : > { %v813_v5 = vld [vmem:[%s796_s0] sm:$0x3f]  ;;  %s800_s8 = scalar_lea.vmem %s2865_s1, %s2538_s27  ;;  %v2252_v22 = vpack.c.bf16 %v1042_v21, %v1041_v20  ;;  %s2867_s30 = sld [smem:[#allocation10_spill]]  ;;  %v1044_v61 = vld [vmem:[%s2866_s9 + $0x18] sm:$0xff]  ;;  %v1046_v3 = vld [vmem:[%s2866_s9 + $0x28] sm:$0xff]  ;;  %v1346_v15 = vsub.s32 1, %v1341_v9 }
  0x1b   : > { %2103 = vmatmul.mubr.msk.f32.vlgmr.msra.gmra.mrb[0].mxu0 %vm824_vm3, %v813_v5  ;;  %v815_v6 = vld [vmem:[%s804_s3] sm:$0x3]  ;;  %s2868_s0 = sld [smem:[#allocation11_spill]]  ;;  %v2256_v0 = vpack.c.bf16 %v1044_v61, %v1043_v60  ;;  %v1047_v5 = vld [vmem:[%s2866_s9 + $0x30] sm:$0xff]  ;;  %v1434_v60 = vld [vmem:[%s2838_s16 + $0x38] sm:$0xff]  ;;  %s2870_s4 = sld [smem:[#allocation8_spill]] }
  0x1c   : > { %v814_v7 = vld [vmem:[%s800_s8] sm:$0x3f]  ;;  %2108 = vmatmul.mubr.msk.f32.vlgmr.msra.gmra.mrb[0].mxu1 %vm910_vm4, %v815_v6  ;;  %2239 = vmatpush3.bf16.msra.mxu0 %v2236_v11  ;;  %v1048_v6 = vld [vmem:[%s2866_s9 + $0x38] sm:$0xff]  ;;  %v1238_v11 = vld [vmem:[%s2834_s12 + $0x30] sm:$0xff]  ;;  %s2379_s8 = smov 96   ;;  %s2382_s2 = smov 52  }
  0x1d   : > { %991 = vperm.xlu0 %2351, %v814_v7   ;;  %2241 = vmatprep.subr.bf16.mxu0 %v2240_v13  ;;  %v1045_v1 = vld [vmem:[%s2866_s9 + $0x20] sm:$0xff]  ;;  %v2264_v7 = vpack.c.bf16 %v1048_v6, %v1047_v5  ;;  %v1440_v6 = vld [vmem:[%s2838_s16 + $0x68] sm:$0xff]  ;;  %s2383_s7 = smov 69   ;;  %s812_s3 = scalar_lea.vmem %s2847_s25, %s2538_s27 }
  0x1e   : > { %2271 = vmatpush3.bf16.msra.mxu1 %v2268_v26  ;;  %v2260_v4 = vpack.c.bf16 %v1046_v3, %v1045_v1  ;;  %v2017_v21 = vld [vmem:[%s2833_s11] ss:$0 sm:$0xff]  ;;  %v1437_v1 = vld [vmem:[%s2838_s16 + $0x50] sm:$0xff]  ;;  %v1438_v3 = vld [vmem:[%s2838_s16 + $0x58] sm:$0xff] }
  0x1f   : > { %2273 = vmatprep.subr.bf16.mxu1 %v2272_v28  ;;  %v1439_v5 = vld [vmem:[%s2838_s16 + $0x60] sm:$0xff] }
  0x20   : > { %2243 = vmatpush3.bf16.msra.mxu0 %v2240_v13  ;;  %v2012_v29 = vld [vmem:[%s2867_s30] ss:$0 sm:$0xff]  ;;  %v2280_v13 = vpack.c.bf16 %v1239_v12, %v1238_v11  ;;  %v1442_v11 = vld [vmem:[%s2838_s16 + $0x78] sm:$0xff]  ;;  %v1342_v12 = vsub.s32 0, %v1341_v9  ;;  %s2380_s30 = smov 20  }
  0x21   : > { %2245 = vmatprep.subr.bf16.mxu0 %v2244_v16  ;;  %v2006_v31 = vld [vmem:[%s2868_s0] ss:$0 sm:$0xff]  ;;  %s808_s29 = scalar_lea.vmem %s2870_s4, %s2538_s27  ;;  %s2384_s4 = smov 68  }
  0x22   : > { %2275 = vmatpush3.bf16.msra.mxu1 %v2272_v28  ;;  %v1332_v28 = vld [vmem:[%s2836_s14 + $0x10] sm:$0xff]  ;;  %v1338_v14 = vld [vmem:[%s2837_s15] sm:$0x3] }
  0x23   : > { %2277 = vmatprep.subr.bf16.mxu1 %v2276_v10 }
  0x24   : > { %2247 = vmatpush3.bf16.msra.mxu0 %v2244_v16  ;;  %v1545_v16 = vld [vmem:[%s2840_s18] sm:$0xff] }
  0x25   : > { %2249 = vmatprep.subr.bf16.mxu0 %v2248_v19 }
  0x26   : > { %2279 = vmatpush3.bf16.msra.mxu1 %v2276_v10  ;;  %v1441_v10 = vld [vmem:[%s2838_s16 + $0x70] sm:$0xff] }
  0x27   : > { %2281 = vmatprep.subr.bf16.mxu1 %v2280_v13 }
  0x28   : > { %2251 = vmatpush3.bf16.msra.mxu0 %v2248_v19  ;;  %v1546_v19 = vld [vmem:[%s2840_s18 + $0x8] sm:$0xff] }
  0x29   : > { %2253 = vmatprep.subr.bf16.mxu0 %v2252_v22  ;;  %v2317_v20 = vpack.c.bf16 %v1546_v19, %v1545_v16  ;;  %v2024_v16 = vld [vmem:[%s2841_s19] ss:$0 sm:$0xff]  ;;  %v1347_v19 = vrot.slane %v1338_v14, %v1346_v15 }
  0x2a   : > { %2283 = vmatpush3.bf16.msra.mxu1 %v2280_v13  ;;  %v2314_v13 = vpack.c.bf16 %v1442_v11, %v1441_v10 }
  0x2b   : > { %2285 = vmatprep.subr.bf16.mxu1 %v2284_v18  ;;  %v1343_v18 = vrot.slane %v1338_v14, %v1342_v12 }
  0x9c   : > { %v992_v30 = vpop.permute.xlu0 %991 }
  0x9d   : > { %v1000_v32 = vmul.f32 %v2012_v29, %v992_v30 }
  0xee   : > { %v898_v34 = vpop.f32.mrb[0].mxu0 }
  0xef   : > { %v899_v35 = vadd.f32 %v2006_v31, %v898_v34  ;;  %v2104_v36 = vpop.f32.mrb[1].mxu0  ;;  %v984_v37 = vpop.f32.mrb[0].mxu1  ;;  %v2286_v31 = vpack.c.bf16 %v1332_v28, %v1330_v27  ;;  %v1337_v34 = vld [vmem:[%s2836_s14 + $0x38] sm:$0xff] }
  0xf0   : > { %v985_v38 = vadd.f32 %v2009_v33, %v984_v37  ;;  %v2109_v39 = vpop.f32.mrb[1].mxu1  ;;  %v1335_v33 = vld [vmem:[%s2836_s14 + $0x28] sm:$0xff]  ;;  %v1548_v37 = vld [vmem:[%s2840_s18 + $0x18] sm:$0xff] }
  0xf1   : > { %v1001_v40 = vadd.f32 %v1000_v32, %v899_v35  ;;  %v1006_v41 = vsub.f32 %v899_v35, %v2012_v29  ;;  %v1547_v35 = vld [vmem:[%s2840_s18 + $0x10] sm:$0xff]  ;;  %v2288_v36 = vpack.c.bf16 %v1337_v34, %v1335_v33 }
  0xf2   : > { %1005 = vst.msk [vmem:[#allocation2 + $0x6] sm:$0x3] %vm1004_vm5, %v985_v38  ;;  %1008 = vst.msk [vmem:[#allocation2 + $0xe] sm:$0x3] %vm1004_vm5, %v985_v38  ;;  %v1334_v38 = vld [vmem:[%s2836_s14 + $0x20] sm:$0xff]  ;;  %v2320_v39 = vpack.c.bf16 %v1548_v37, %v1547_v35 }
  0xf3   : > { %1003 = vst.msk [vmem:[#allocation2] sm:$0x3f] %vm1002_vm6, %v1001_v40  ;;  %1007 = vst.msk [vmem:[#allocation2 + $0x8] sm:$0x3f] %vm1002_vm6, %v1006_v41  ;;  %v1336_v40 = vld [vmem:[%s2836_s14 + $0x30] sm:$0xff] }
  0xf4   : > { %v2290_v41 = vpack.c.bf16 %v1336_v40, %v1334_v38  ;;  %v1535_v40 = vld [vmem:[%s808_s29] sm:$0xff] }
  0xfa   : > { %v2602_v42 = vld [vmem:[#allocation2] sm:$0xff]  ;;  %v2604_v43 = vld [vmem:[#allocation2 + $0x8] sm:$0xff] }
  0xfb   : > { %v1012_v44 = vsel %vm1011_vm7, %v2602_v42, 0.0  ;;  %v1019_v45 = vsel %vm1011_vm7, %v2604_v43, 0.0 }
  0xfc   : > { %v1013_v46 = vrot.slane %v1012_v44, 4  ;;  %v1020_v47 = vrot.slane %v1019_v45, 4 }
  0xfe   : > { %v1014_v48 = vadd.f32 %v1013_v46, %v1012_v44  ;;  %v1021_v49 = vadd.f32 %v1020_v47, %v1019_v45 }
 0x100   : > { %v1015_v50 = vrot.slane %v1014_v48, 2  ;;  %v1022_v51 = vrot.slane %v1021_v49, 2 }
 0x102   : > { %v1016_v52 = vadd.f32 %v1015_v50, %v1014_v48  ;;  %v1023_v53 = vadd.f32 %v1022_v51, %v1021_v49  ;;  %v1631_v49 = vld [vmem:[%s2843_s21] sm:$0xff]  ;;  %v1428_v51 = vld [vmem:[%s2838_s16 + $0x8] sm:$0xff] }
 0x103   : > { %v1427_v50 = vld [vmem:[%s2838_s16] sm:$0xff] }
 0x104   : > { %v1017_v54 = vrot.slane %v1016_v52, 1  ;;  %v1024_v55 = vrot.slane %v1023_v53, 1 }
 0x106   : > { %v1018_v56 = vadd.f32 %v1017_v54, %v1016_v52  ;;  %v1025_v57 = vadd.f32 %v1024_v55, %v1023_v53  ;;  %v1429_v52 = vld [vmem:[%s2838_s16 + $0x10] sm:$0xff]  ;;  %v2293_v53 = vpack.c.bf16 %v1428_v51, %v1427_v50  ;;  %v1430_v54 = vld [vmem:[%s2838_s16 + $0x18] sm:$0xff] }
 0x107   : > { %v2296_v55 = vpack.c.bf16 %v1430_v54, %v1429_v52  ;;  %v1791_v51 = vld [vmem:[%s2845_s23 + $0x10] sm:$0xff] }
 0x108   : > { %v1037_v58 = vadd.f32 %v1018_v56, %v2602_v42  ;;  %v1038_v59 = vadd.f32 %v1025_v57, %v2604_v43  ;;  %v1431_v56 = vld [vmem:[%s2838_s16 + $0x20] sm:$0xff]  ;;  %v1432_v57 = vld [vmem:[%s2838_s16 + $0x28] sm:$0xff]  ;;  %v2022_v52 = vld [vmem:[#allocation3] ss:$0 sm:$0xff] }
 0x10a   : > { %v1039_v62 = vmul.f32 0.11111111, %v1037_v58  ;;  %v1040_v63 = vmul.f32 0.11111111, %v1038_v59  ;;  %v2299_v58 = vpack.c.bf16 %v1432_v57, %v1431_v56  ;;  %v1433_v59 = vld [vmem:[%s2838_s16 + $0x30] sm:$0xff] }
 0x10b   : > { %v2302_v61 = vpack.c.bf16 %v1434_v60, %v1433_v59 }
 0x10c   : > { %2126 = vmatprep.mubr.msk.f32.mxu0 %vm1011_vm7, %v1039_v62  ;;  %v1435_v62 = vld [vmem:[%s2838_s16 + $0x40] sm:$0xff] }
 0x10d   : > { %2127 = vmatmul.mubr.msk.f32.vlgmr.msra.gmra.mrb[2].mxu0 %vm1011_vm7, %v1040_v63  ;;  %v1436_v63 = vld [vmem:[%s2838_s16 + $0x48] sm:$0xff] }
 0x10e   : > { %2255 = vmatpush3.bf16.msra.mxu0 %v2252_v22  ;;  %2145 = vmatprep.mubr.msk.f32.mxu0 %vm1011_vm7, %v2602_v42 }
 0x10f   : > { %2257 = vmatprep.subr.bf16.mxu0 %v2256_v0 }
 0x112   : > { %2259 = vmatpush3.bf16.msra.mxu0 %v2256_v0  ;;  %v2305_v0 = vpack.c.bf16 %v1436_v63, %v1435_v62 }
 0x113   : > { %2261 = vmatprep.subr.bf16.mxu0 %v2260_v4 }
 0x116   : > { %2263 = vmatpush3.bf16.msra.mxu0 %v2260_v4  ;;  %v2308_v4 = vpack.c.bf16 %v1438_v3, %v1437_v1  ;;  %v2029_v1 = vld [vmem:[%s2846_s24] ss:$0 sm:$0xff] }
 0x117   : > { %2265 = vmatprep.subr.bf16.mxu0 %v2264_v7 }
 0x11a   : > { %2267 = vmatpush3.bf16.msra.mxu0 %v2264_v7  ;;  %v2311_v7 = vpack.c.bf16 %v1440_v6, %v1439_v5 }
 0x11b   : > { %2316 = vmatprep.subr.bf16.mxu0 %v2378_v17 }
 0x11d   : > { %2146 = vmatmul.mubr.msk.f32.vlgmr.msra.gmra.mrb[2].mxu0 %vm1011_vm7, %v2604_v43 }
 0x11e   : > { %2210 = vmatprep.mubr.msk.f32.mxu0 %vm2376_vm1, %v2375_v2  ;;  %2318 = vmatpush3.bf16.msra.mxu0 %v2317_v20 }
 0x11f   : > { %2319 = vmatprep.subr.bf16.mxu0 %v2378_v17 }
 0x122   : > { %2321 = vmatpush3.bf16.msra.mxu0 %v2320_v39 }
 0x123   : > { %2213 = vmatprep.subr.mxu0 %v2375_v2 }
 0x1f0   : > { %v2147_v22 = vpop.f32.mrb[2].mxu0 }
 0x1f1   : > { %v1227_v23 = vadd.f32 %v2147_v22, %v2017_v21  ;;  %v1210_v24 = vpop.f32.mrb[3].mxu0 }
 0x1f2   : > { %v1226_v25 = vadd.f32 %v2017_v21, %v1210_v24 }
 0x1f3   : > { %v1229_v26 = vmax.f32 %v1227_v23, 0.0 }
 0x1f4   : > { %v1228_v29 = vmax.f32 %v1226_v25, 0.0 }
 0x1f5   : > { %v1231_v32 = vadd.f32 %v1229_v26, %v2604_v43 }
 0x1f6   : > { %v1230_v30 = vadd.f32 %v1228_v29, %v2602_v42  ;;  %v2018_v42 = vld [vmem:[%s2835_s13] ss:$0 sm:$0xff] }
 0x1f7   : > { %v1629_v29 = vld [vmem:[%s2842_s20] sm:$0xff] }
 0x1f8   : > { %2164 = vmatprep.mubr.msk.f32.mxu1 %vm1011_vm7, %v1230_v30  ;;  %v1630_v30 = vld [vmem:[%s2842_s20 + $0x8] sm:$0xff] }
 0x1f9   : > { %2165 = vmatmul.mubr.msk.f32.vlgmr.msra.gmra.mrb[2].mxu1 %vm1011_vm7, %v1231_v32  ;;  %v2323_v32 = vpack.c.bf16 %v1630_v30, %v1629_v29 }
 0x1fa   : > { %2287 = vmatpush1.bf16.msra.mxu1 %v2286_v31  ;;  %1418 = vmatprep.mubr.f32.mxu1 %v2375_v2 }
 0x1fb   : > { %2289 = vmatprep.subr.bf16.mxu1 %v2288_v36 }
 0x1fe   : > { %2291 = vmatpush1.bf16.msra.mxu1 %v2290_v41 }
 0x1ff   : > { %2292 = vmatprep.subr.bf16.mxu1 %v2378_v17 }
 0x2cc   : > { %v2166_v43 = vpop.f32.mrb[2].mxu1 }
 0x2cd   : > { %v1325_v44 = vadd.f32 %v2166_v43, %v2018_v42  ;;  %v1319_v45 = vpop.f32.mrb[3].mxu1 }
 0x2ce   : > { %v2701_v46 = vadd.f32 %v2018_v42, %v1319_v45 }
 0x2cf   : > { %v1329_v47 = vmax.f32 %v1325_v44, 0.0 }
 0x2d0   : > { %v1328_v48 = vmax.f32 %v2701_v46, 0.0  ;;  %v1792_v46 = vld [vmem:[%s2845_s23 + $0x18] sm:$0xff] }
 0x2d1   : > { %2211 = vmatmul.mubr.msk.f32.vlgmr.msra.gmra.mrb[4].mxu0 %vm1350_vm8, %v1329_v47  ;;  %v1789_v47 = vld [vmem:[%s2845_s23] sm:$0xff] }
 0x2d2   : > { %2021 = vmatmul.mubr.msk.f32.vlgmr.msra.gmra.mrb[4].mxu1 %vm1350_vm8, %v1328_v48  ;;  %2215 = vmatprep.mubr.msk.f32.mxu0 %vm2376_vm1, %v2375_v2 }
 0x2d3   : > { %2199 = vmatprep.mubr.msk.f32.mxu1 %vm2376_vm1, %v2375_v2  ;;  %2214 = vmatpush3.msra.mxu0 %v1631_v49  ;;  %v1790_v49 = vld [vmem:[%s2845_s23 + $0x8] sm:$0xff] }
 0x2d4   : > { %2322 = vmatprep.subr.bf16.mxu0 %v2378_v17  ;;  %2294 = vmatpush3.bf16.msra.mxu1 %v2293_v53  ;;  %v2326_v50 = vpack.c.bf16 %v1790_v49, %v1789_v47 }
 0x2d5   : > { %2295 = vmatprep.subr.bf16.mxu1 %v2378_v17 }
 0x2d8   : > { %2297 = vmatpush3.bf16.msra.mxu1 %v2296_v55 }
 0x2d9   : > { %2298 = vmatprep.subr.bf16.mxu1 %v2378_v17 }
 0x2dc   : > { %2300 = vmatpush3.bf16.msra.mxu1 %v2299_v58 }
 0x2dd   : > { %2301 = vmatprep.subr.bf16.mxu1 %v2378_v17 }
 0x2e0   : > { %2303 = vmatpush3.bf16.msra.mxu1 %v2302_v61 }
 0x2e1   : > { %2304 = vmatprep.subr.bf16.mxu1 %v2378_v17 }
 0x2e4   : > { %2306 = vmatpush3.bf16.msra.mxu1 %v2305_v0 }
 0x2e5   : > { %2307 = vmatprep.subr.bf16.mxu1 %v2378_v17 }
 0x2e8   : > { %2309 = vmatpush3.bf16.msra.mxu1 %v2308_v4 }
 0x2e9   : > { %2310 = vmatprep.subr.bf16.mxu1 %v2378_v17 }
 0x2ec   : > { %2312 = vmatpush3.bf16.msra.mxu1 %v2311_v7 }
 0x2ed   : > { %2313 = vmatprep.subr.bf16.mxu1 %v2378_v17 }
 0x2f0   : > { %2315 = vmatpush3.bf16.msra.mxu1 %v2314_v13 }
 0x3a4   : > { %v1625_v20 = vpop.f32.mrb[4].mxu0 }
 0x3a5   : > { %v1626_v21 = vadd.f32 %v2024_v16, %v1625_v20  ;;  %v1420_v22 = vpop.f32.mrb[4].mxu1  ;;  %v2212_v23 = vpop.f32.mrb[5].mxu0 }
 0x3a6   : > { %v1421_v24 = vadd.f32 %v1420_v22, %v1343_v18  ;;  %v1422_v25 = vpop.f32.mrb[5].mxu1 }
 0x3a7   : > { %v1423_v26 = vadd.f32 %v1422_v25, %v1347_v19  ;;  %2216 = vmatmul.mubr.msk.f32.vlgmr.msra.gmra.mrb[6].mxu0 %vm1632_vm9, %v1626_v21 }
 0x3a8   : > { %v1536_v27 = vmul.f32 0.5, %v1421_v24  ;;  %v1425_v28 = vmax.f32 %v1421_v24, 0.0  ;;  %2222 = vmatprep.mubr.msk.f32.mxu0 %vm2376_vm1, %v2375_v2  ;;  %2324 = vmatpush3.bf16.msra.mxu0 %v2323_v32 }
 0x3a9   : > { %v1426_v31 = vmax.f32 %v1423_v26, 0.0  ;;  %2325 = vmatprep.subr.bf16.mxu0 %v2378_v17 }
 0x3aa   : > { %v1537_v33 = vmul.f32 1.442695, %v1536_v27 }
 0x3ab   : > { %v2352_v34 = vpack.i.bf16 %v1426_v31, %v1425_v28 }
 0x3ac   : > { %2357 = vpow2.f32 %v1537_v33 }
 0x3ad   : > { %2353 = vrot.lane.b32.xlu1 %v2352_v34, %s2379_s8 }
 0x3b1   : > { %1882 = vrot.lane.b32.xlu1 %v1421_v24, %s2380_s30 }
 0x3b6   : > { %v2358_v35 = vpop.eup %2357 }
 0x3b7   : > { %1540 = vrot.lane.b32.xlu0 %v2358_v35, %s2381_s28 }
 0x41f   : > { %v2354_v36 = vpop.permute.xlu1 %2353 }
 0x420   : > { %v2356_v37 = vunpack.i.h.bf16 %v2354_v36  ;;  %v2355_v38 = vunpack.i.l.bf16 %v2354_v36 }
 0x422   : > { %v1457_v39 = vsel %vm1456_vm10, %v2355_v38, %v2356_v37 }
 0x423   : > { %2200 = vmatmul.mubr.f32.vlgmr.msra.gmra.mrb[6].mxu1 %v1457_v39  ;;  %v1883_v11 = vpop.permute.xlu1 %1882 }
 0x429   : > { %v1541_v41 = vpop.permute.xlu0 %1540 }
 0x42a   : > { %v1543_v42 = vmul.f32 %v1541_v41, %v1535_v40 }
 0x42c   : > { %v1544_v43 = vadd.f32 %v1543_v42, %v1421_v24 }
 0x42e   : > { %1889 = vrot.lane.b32.xlu0 %v1544_v43, %s2382_s2  ;;  %2223 = vmatmul.mubr.msk.f32.vlgmr.msra.gmra.mrb[8].mxu0 %vm1706_vm11, %v1544_v43 }
 0x42f   : > { %2233 = vmatprep.mubr.msk.f32.mxu0 %vm2376_vm1, %v2375_v2  ;;  %2327 = vmatpush3.bf16.msra.mxu0 %v2326_v50  ;;  %vm1903_vm1 = vcmask 826920  }
 0x430   : > { %2328 = vmatprep.subr.bf16.mxu0 %v2378_v17  ;;  %v2028_v17 = vld [vmem:[%s2844_s22] ss:$0 sm:$0xff] }
 0x432   : > { %1900 = vrot.lane.b32.xlu0 %v1328_v48, %s2383_s7  ;;  %v2329_v48 = vpack.c.bf16 %v1792_v46, %v1791_v51 }
 0x434   : > { %2330 = vmatpush3.bf16.msra.mxu0 %v2329_v48 }
 0x47a   : > { %v1702_v44 = vpop.f32.mrb[6].mxu0 }
 0x47b   : > { %v2217_v45 = vpop.f32.mrb[7].mxu0 }
 0x4a0   : > { %v1890_v9 = vpop.permute.xlu0 %1889 }
 0x4a4   : > { %v1901_v13 = vpop.permute.xlu0 %1900 }
 0x4f6   : > { %v1525_v53 = vpop.f32.mrb[6].mxu1 }
 0x4f7   : > { %v1526_v54 = vadd.f32 %v2022_v52, %v1525_v53  ;;  %v2201_v55 = vpop.f32.mrb[7].mxu1 }
 0x4f9   : > { %v2023_v56 = vmul.f32 -1.442695, %v1526_v54 }
 0x4fb   : > { %2359 = vpow2.f32 %v2023_v56 }
 0x501   : > { %v1776_v57 = vpop.f32.mrb[8].mxu0 }
 0x502   : > { %v1777_v58 = vadd.f32 %v1776_v57, %v1702_v44  ;;  %v2224_v59 = vpop.f32.mrb[9].mxu0 }
 0x504   : > { %v1787_v60 = vadd.f32 %v2028_v17, %v1777_v58 }
 0x505   : > { %v2360_v61 = vpop.eup %2359 }
 0x506   : > { %v1532_v62 = vadd.f32 1.0, %v2360_v61  ;;  %v1788_v63 = vmax.f32 %v1787_v60, 0.0 }
 0x508   : > { %2361 = vrcp.f32 %v1532_v62  ;;  %2234 = vmatmul.mubr.msk.f32.vlgmr.msra.gmra.mrb[10].mxu0 %vm1350_vm8, %v1788_v63 }
 0x512   : > { %v2362_v0 = vpop.eup %2361 }
 0x513   : > { %1895 = vrot.lane.b32.xlu1 %v2362_v0, %s2384_s4 }
 0x585   : > { %v1896_v12 = vpop.permute.xlu1 %1895 }
 0x5db   : > { %v1869_v3 = vpop.f32.mrb[10].mxu0 }
 0x5dc   : > { %v1870_v4 = vadd.f32 %v2029_v1, %v1869_v3  ;;  %v2235_v5 = vpop.f32.mrb[11].mxu0 }
 0x5de   : > { %v2031_v6 = vmul.f32 -1.442695, %v1870_v4 }
 0x5e0   : > { %2363 = vpow2.f32 %v2031_v6 }
 0x5ea   : > { %v2364_v7 = vpop.eup %2363 }
 0x5eb   : > { %v1876_v8 = vadd.f32 1.0, %v2364_v7 }
 0x5ed   : > { %2365 = vrcp.f32 %v1876_v8 }
 0x5f7   : > { %v2366_v10 = vpop.eup %2365 }
 0x5f8   : > { %1880 = vst.msk [vmem:[%s812_s3] sm:$0xff] %vm1879_vm12, %v2366_v10 }
 0x5f9   : > { %1886 = vst.msk [vmem:[%s812_s3] sm:$0xff] %vm1885_vm13, %v1883_v11 }
 0x5fa   : > { %1888 = vst.msk [vmem:[%s812_s3] sm:$0xff] %vm1887_vm14, %v1883_v11 }
 0x5fb   : > { %1893 = vst.msk [vmem:[%s812_s3] sm:$0xff] %vm1892_vm15, %v1890_v9 }
 0x5fc   : > { %1899 = vst.msk [vmem:[%s812_s3] sm:$0xff] %vm1898_vm0, %v1896_v12 }
 0x5fd   : > { %1904 = vst.msk [vmem:[%s812_s3] sm:$0xff] %vm1903_vm1, %v1901_v13 }
 0x5fe   : > { %1906 = vst.msk [vmem:[%s812_s3] sm:$0xff] %vm1905_vm2, %v2375_v2 }
 0x5ff PF: > { %s2871_s27 = sld [smem:[#allocation4_spill]] }
 0x605   : > { %s37_s6 = sadd.s32 1, %s2871_s27  }
 0x606   : > { %p34_p4 = scmp.ge.s32.totalorder %s37_s6, 4  }
 0x608   :  { %36 = sbr.rel (!%p34_p4) target bundleno = 11 (0xb), region = 159 }

</bundles_post_ra>
